<compile_context>
chip_gen: v5e
topology: v5e:2x2
jax: 0.10.0
libtpu: 0.0.40
codegen_flags: <defaults>
</compile_context>

<pallas_src>
import functools
import math

import jax
import jax.numpy as jnp
from jax.experimental import pallas as pl
from jax.experimental.pallas import tpu as pltpu

_EPS = 1e-12  # F.normalize eps (norm clamped by eps == sumsq clamped by eps^2)


def _arcface_stats_kernel(feat_ref, wtgt_ref, t_ref,
                          xn_out_ref, ctm_out_ref, fts_out_ref, t_out_ref, *,
                          cos_m, sin_m, threshold, mm, s):
    """bf16-normalized features, hoisted (B,1) margin terms, updated `t`."""
    x = feat_ref[...].astype(jnp.float32)                        # (B, D)
    x_inv = jax.lax.rsqrt(
        jnp.maximum(jnp.sum(x * x, axis=1, keepdims=True), _EPS * _EPS))
    xn_bf = (x * x_inv).astype(jnp.bfloat16)
    xn_out_ref[...] = xn_bf                                      # stage-2 MXU operand

    # Gathered target weight rows, already bf16-rounded like the streamed
    # stage-2 weight, so the target cosine matches the stage-2 column value
    # (up to f32 accumulation order; that column is overwritten anyway).
    wt = wtgt_ref[...].astype(jnp.float32)                       # (B, D)
    wt_inv = jax.lax.rsqrt(
        jnp.maximum(jnp.sum(wt * wt, axis=1, keepdims=True), _EPS * _EPS))
    xb = xn_bf.astype(jnp.float32)
    tl = jnp.clip(jnp.sum(xb * wt, axis=1, keepdims=True) * wt_inv,
                  -1.0, 1.0)                                     # (B, 1) target cosine

    # (B,1) margin math hoisted out of the class-tiled hot loop.
    sin_theta = jnp.sqrt(jnp.maximum(1.0 - tl * tl, 0.0))
    cos_theta_m = tl * cos_m - sin_theta * sin_m
    ctm_out_ref[...] = cos_theta_m
    final_target = jnp.where(tl > threshold, cos_theta_m, tl - mm)
    fts_out_ref[...] = final_target * s                          # pre-scaled by s

    # Running stat: updated first, then consumed by stage 2 (PyTorch ordering).
    t_out_ref[...] = jnp.mean(tl, keepdims=True) * 0.01 + 0.99 * t_ref[0, 0]


def _arcface_logits_kernel(xn_ref, w_ref, tgt_ref, ctm_ref, fts_ref, t_ref,
                           out_ref, *, s, c_tile):
    """One (B, c_tile) logits tile: raw bf16 matmul + column scale + epilogue."""
    j = pl.program_id(0)

    w = w_ref[...]                                               # (c_tile, D) bf16
    w32 = w.astype(jnp.float32)
    # Per-class inverse norm applied to the (B, c_tile) result instead of
    # normalizing the full (c_tile, D) tile (cheaper wide-op footprint).
    ssq = jnp.sum(w32 * w32, axis=1)                             # (c_tile,)
    w_inv = jax.lax.rsqrt(jnp.maximum(ssq, _EPS * _EPS))

    # bf16 operands on the MXU, f32 accumulation (A @ B.T contraction).
    dot = jax.lax.dot_general(xn_ref[...], w, (((1,), (1,)), ((), ())),
                              preferred_element_type=jnp.float32)
    cos = jnp.clip(dot * w_inv[None, :], -1.0, 1.0)              # (B, c_tile)

    t_new = t_ref[0, 0]                                          # updated stat (SMEM)
    mask = cos > ctm_ref[...]                                    # hard-example mask
    cos_mod = jnp.where(mask, cos * (t_new + cos), cos)

    # One-hot scatter of the pre-scaled target logit; the tile offset is
    # folded into the (B,1) target vector, not the wide iota.
    col = jax.lax.broadcasted_iota(jnp.int32, cos.shape, 1)
    onehot = col == (tgt_ref[...] - j * c_tile)
    # TODO(synk): on v5e, a bf16 logits output would halve store-slot/HBM
    # write traffic if the downstream loss tolerates it (numerics-visible).
    out_ref[...] = jnp.where(onehot, fts_ref[...], cos_mod * s)


def _round_up(x, n):
    return (x + n - 1) // n * n


def arcface_forward(features, weight, targets, t, *, s, m):
    B, D = features.shape
    C = weight.shape[0]

    targets2d = targets.reshape(B, 1).astype(jnp.int32)
    t2d = t.reshape(1, 1).astype(jnp.float32)

    # Stream the class weights as bf16 (the MXU operand dtype): halves the
    # dominant HBM read (C*D bytes) on every generation.
    w_bf16 = weight.astype(jnp.bfloat16)
    # Tiny gather of only the B target rows for the stats kernel.
    w_tgt = jnp.take(w_bf16, targets2d[:, 0], axis=0)            # (B, D) bf16

    vmem = pl.BlockSpec(memory_space=pltpu.MemorySpace.VMEM)
    smem = pl.BlockSpec(memory_space=pltpu.MemorySpace.SMEM)

    # ---- Stage 1: normalized features + hoisted per-row margin terms ----
    stats_kernel = functools.partial(
        _arcface_stats_kernel,
        cos_m=math.cos(m), sin_m=math.sin(m),
        threshold=math.cos(math.pi - m), mm=math.sin(math.pi - m) * m,
        s=float(s))
    xn_bf16, cos_theta_m, final_target_s, t_new = pl.pallas_call(
        stats_kernel,
        out_shape=(jax.ShapeDtypeStruct((B, D), jnp.bfloat16),
                   jax.ShapeDtypeStruct((B, 1), jnp.float32),
                   jax.ShapeDtypeStruct((B, 1), jnp.float32),
                   jax.ShapeDtypeStruct((1, 1), jnp.float32)),
        in_specs=[vmem, vmem, smem],
        out_specs=(vmem, vmem, vmem, vmem),
    )(features, w_tgt, t2d)

    # ---- Stage 2: class-tiled, pipelined cosine matmul + margin epilogue ----
    # Pad C up to a fixed large tile (lane-dense stores, large DMAs, short
    # grid) rather than shrinking the tile to fit C.
    if C <= 512:
        c_tile = _round_up(C, 128)
        c_pad = c_tile
    else:
        c_tile = 512
        c_pad = _round_up(C, c_tile)
    w_padded = w_bf16 if c_pad == C else jnp.pad(w_bf16, ((0, c_pad - C), (0, 0)))
    grid = (c_pad // c_tile,)

    kernel = functools.partial(_arcface_logits_kernel, s=float(s), c_tile=c_tile)

    # Double-buffered bf16 weight tile + resident bf16 xn + double-buffered
    # f32 output tile + slack; clamp to a v7x-safe (< 64 MiB physical) window.
    vmem_est = (2 * c_tile * D * 2 + 2 * B * D * 2
                + 2 * B * c_tile * 4 + (4 << 20))
    vmem_limit = int(min(max(vmem_est, 16 << 20), 48 << 20))

    cost = pl.CostEstimate(
        flops=2 * B * c_pad * D,
        transcendentals=c_pad + 2 * B,
        bytes_accessed=c_pad * D * 2 + B * D * 2 + B * c_pad * 4)

    # TODO(synk): on v7x, verify the class axis actually shards across both
    # TensorCores; if not, switch to pltpu.CORE_PARALLEL / an explicit 2-wide
    # leading grid axis.
    logits = pl.pallas_call(
        kernel,
        out_shape=jax.ShapeDtypeStruct((B, c_pad), jnp.float32),
        grid=grid,
        in_specs=[
            pl.BlockSpec((B, D), lambda j: (0, 0)),       # xn (bf16, resident)
            pl.BlockSpec((c_tile, D), lambda j: (j, 0)),  # weight (bf16, streamed)
            pl.BlockSpec((B, 1), lambda j: (0, 0)),       # targets
            pl.BlockSpec((B, 1), lambda j: (0, 0)),       # cos_theta_m
            pl.BlockSpec((B, 1), lambda j: (0, 0)),       # final_target * s
            smem,                                         # updated t (scalar)
        ],
        out_specs=pl.BlockSpec((B, c_tile), lambda j: (0, j)),
        compiler_params=pltpu.CompilerParams(
            dimension_semantics=("parallel",),
            vmem_limit_bytes=vmem_limit),
        cost_estimate=cost,
    )(xn_bf16, w_padded, targets2d, cos_theta_m, final_target_s, t_new)

    return logits[:, :C], t_new.reshape(1)


def _arcface_reference(features, weight, targets, t, *, s, m):
    """Pure-JAX reference mirroring the PyTorch forward (bf16 MXU operands,
    post-matmul per-column inverse-norm scaling, same as the kernel path)."""
    cos_m, sin_m = math.cos(m), math.sin(m)
    threshold = math.cos(math.pi - m)
    mm = math.sin(math.pi - m) * m
    x = features.astype(jnp.float32)
    xn = x * jax.lax.rsqrt(
        jnp.maximum(jnp.sum(x * x, axis=1, keepdims=True), _EPS * _EPS))
    xn_bf = xn.astype(jnp.bfloat16)
    w_bf = weight.astype(jnp.bfloat16)
    w32 = w_bf.astype(jnp.float32)
    w_inv = jax.lax.rsqrt(
        jnp.maximum(jnp.sum(w32 * w32, axis=1), _EPS * _EPS))
    cos_theta = jnp.dot(xn_bf, w_bf.T,
                        preferred_element_type=jnp.float32) * w_inv[None, :]
    cos_theta = jnp.clip(cos_theta, -1.0, 1.0)
    target_logit = cos_theta[jnp.arange(x.shape[0]), targets][:, None]
    sin_theta = jnp.sqrt(jnp.maximum(1.0 - target_logit ** 2, 0.0))
    cos_theta_m = target_logit * cos_m - sin_theta * sin_m
    mask = cos_theta > cos_theta_m
    final_target_logit = jnp.where(target_logit > threshold,
                                   cos_theta_m, target_logit - mm)
    t_new = jnp.mean(target_logit) * 0.01 + 0.99 * t[0]
    cos_theta = jnp.where(mask, cos_theta * (t_new + cos_theta), cos_theta)
    onehot = jax.nn.one_hot(targets, weight.shape[0], dtype=bool)
    cos_theta = jnp.where(onehot, final_target_logit, cos_theta)
    return cos_theta * s, t_new.reshape(1)


if __name__ == "__main__":
    key = jax.random.PRNGKey(0)
    k_feat, k_w, k_tgt = jax.random.split(key, 3)

    B, in_feat, num_classes = 8, 32, 16
    scale, margin = 30.0, 0.5

    features = jax.random.normal(k_feat, (B, in_feat), jnp.float32)
    # Deterministic synthetic weight for nn.Parameter(num_classes, in_feat).
    weight = jax.random.normal(k_w, (num_classes, in_feat), jnp.float32)
    targets = jax.random.randint(k_tgt, (B,), 0, num_classes, jnp.int32)
    t_buf = jnp.zeros((1,), jnp.float32)   # registered buffer 't'

    logits, t_new = arcface_forward(features, weight, targets, t_buf,
                                    s=scale, m=margin)
    jax.block_until_ready((logits, t_new))

    ref_logits, ref_t = _arcface_reference(features, weight, targets, t_buf,
                                           s=scale, m=margin)
    assert logits.shape == (B, num_classes)
    assert bool(jnp.allclose(logits, ref_logits, rtol=2e-3, atol=2e-2)), \
        float(jnp.max(jnp.abs(logits - ref_logits)))
    assert bool(jnp.allclose(t_new, ref_t, rtol=1e-3, atol=1e-5))

    print("KERNEL_OK")
</pallas_src>

<mosaic_0001>
module attributes {stable_mosaic.version = 11 : i64} {
  func.func @_arcface_stats_kernel(%arg0: memref<8x32xf32, #tpu.memory_space<vmem>>, %arg1: memref<8x32xbf16, #tpu.memory_space<vmem>>, %arg2: memref<1x1xf32, #tpu.memory_space<smem>>, %arg3: memref<8x32xbf16, #tpu.memory_space<vmem>>, %arg4: memref<8x1xf32, #tpu.memory_space<vmem>>, %arg5: memref<8x1xf32, #tpu.memory_space<vmem>>, %arg6: memref<1x1xf32, #tpu.memory_space<vmem>>) attributes {dimension_semantics = [], scalar_prefetch = 0 : i64, scratch_operands = 0 : i64, tpu.core_type = #tpu.core_type<tc>} {
    %c0 = arith.constant 0 : index
    %c0_0 = arith.constant 0 : index
    %0 = vector.load %arg0[%c0, %c0_0] : memref<8x32xf32, #tpu.memory_space<vmem>>, vector<8x32xf32>
    %1 = arith.mulf %0, %0 : vector<8x32xf32>
    %cst = arith.constant dense<0.000000e+00> : vector<8xf32>
    %2 = vector.multi_reduction <add>, %1, %cst [1] : vector<8x32xf32> to vector<8xf32>
    %3 = vector.shape_cast %2 : vector<8xf32> to vector<8x1xf32>
    %cst_1 = arith.constant 1.000000e-24 : f32
    %4 = vector.broadcast %cst_1 : f32 to vector<8x1xf32>
    %5 = arith.maximumf %3, %4 : vector<8x1xf32>
    %6 = math.rsqrt %5 : vector<8x1xf32>
    %7 = vector.broadcast %6 : vector<8x1xf32> to vector<8x32xf32>
    %8 = arith.mulf %0, %7 : vector<8x32xf32>
    %9 = arith.truncf %8 : vector<8x32xf32> to vector<8x32xbf16>
    %c0_2 = arith.constant 0 : index
    %c0_3 = arith.constant 0 : index
    %10 = vector.load %arg3[%c0_2, %c0_3] : memref<8x32xbf16, #tpu.memory_space<vmem>>, vector<8x32xbf16>
    tpu.vector_store %arg3[%c0_2, %c0_3], %9 {strides = array<i32>} : memref<8x32xbf16, #tpu.memory_space<vmem>>, vector<8x32xbf16>,
    %c0_4 = arith.constant 0 : index
    %c0_5 = arith.constant 0 : index
    %11 = vector.load %arg1[%c0_4, %c0_5] : memref<8x32xbf16, #tpu.memory_space<vmem>>, vector<8x32xbf16>
    %12 = arith.extf %11 : vector<8x32xbf16> to vector<8x32xf32>
    %13 = arith.mulf %12, %12 : vector<8x32xf32>
    %cst_6 = arith.constant dense<0.000000e+00> : vector<8xf32>
    %14 = vector.multi_reduction <add>, %13, %cst_6 [1] : vector<8x32xf32> to vector<8xf32>
    %15 = vector.shape_cast %14 : vector<8xf32> to vector<8x1xf32>
    %cst_7 = arith.constant 1.000000e-24 : f32
    %16 = vector.broadcast %cst_7 : f32 to vector<8x1xf32>
    %17 = arith.maximumf %15, %16 : vector<8x1xf32>
    %18 = math.rsqrt %17 : vector<8x1xf32>
    %19 = arith.extf %9 : vector<8x32xbf16> to vector<8x32xf32>
    %20 = arith.mulf %19, %12 : vector<8x32xf32>
    %cst_8 = arith.constant dense<0.000000e+00> : vector<8xf32>
    %21 = vector.multi_reduction <add>, %20, %cst_8 [1] : vector<8x32xf32> to vector<8xf32>
    %22 = vector.shape_cast %21 : vector<8xf32> to vector<8x1xf32>
    %23 = arith.mulf %22, %18 : vector<8x1xf32>
    %cst_9 = arith.constant -1.000000e+00 : f32
    %cst_10 = arith.constant 1.000000e+00 : f32
    %24 = vector.broadcast %cst_9 : f32 to vector<8x1xf32>
    %25 = arith.maximumf %24, %23 : vector<8x1xf32>
    %26 = vector.broadcast %cst_10 : f32 to vector<8x1xf32>
    %27 = arith.minimumf %26, %25 : vector<8x1xf32>
    %28 = arith.mulf %27, %27 : vector<8x1xf32>
    %cst_11 = arith.constant 1.000000e+00 : f32
    %29 = vector.broadcast %cst_11 : f32 to vector<8x1xf32>
    %30 = arith.subf %29, %28 : vector<8x1xf32>
    %cst_12 = arith.constant 0.000000e+00 : f32
    %31 = vector.broadcast %cst_12 : f32 to vector<8x1xf32>
    %32 = arith.maximumf %30, %31 : vector<8x1xf32>
    %33 = math.sqrt %32 : vector<8x1xf32>
    %cst_13 = arith.constant 0.87758255 : f32
    %34 = vector.broadcast %cst_13 : f32 to vector<8x1xf32>
    %35 = arith.mulf %27, %34 : vector<8x1xf32>
    %cst_14 = arith.constant 0.47942555 : f32
    %36 = vector.broadcast %cst_14 : f32 to vector<8x1xf32>
    %37 = arith.mulf %33, %36 : vector<8x1xf32>
    %38 = arith.subf %35, %37 : vector<8x1xf32>
    %c0_15 = arith.constant 0 : index
    %c0_16 = arith.constant 0 : index
    %39 = vector.load %arg4[%c0_15, %c0_16] : memref<8x1xf32, #tpu.memory_space<vmem>>, vector<8x1xf32>
    tpu.vector_store %arg4[%c0_15, %c0_16], %38 {strides = array<i32>} : memref<8x1xf32, #tpu.memory_space<vmem>>, vector<8x1xf32>,
    %cst_17 = arith.constant -0.87758255 : f32
    %40 = vector.broadcast %cst_17 : f32 to vector<8x1xf32>
    %41 = arith.cmpf ogt, %27, %40 : vector<8x1xf32>
    %cst_18 = arith.constant 0.239712775 : f32
    %42 = vector.broadcast %cst_18 : f32 to vector<8x1xf32>
    %43 = arith.subf %27, %42 : vector<8x1xf32>
    %44 = arith.select %41, %38, %43 : vector<8x1xi1>, vector<8x1xf32>
    %cst_19 = arith.constant 3.000000e+01 : f32
    %45 = vector.broadcast %cst_19 : f32 to vector<8x1xf32>
    %46 = arith.mulf %44, %45 : vector<8x1xf32>
    %c0_20 = arith.constant 0 : index
    %c0_21 = arith.constant 0 : index
    %47 = vector.load %arg5[%c0_20, %c0_21] : memref<8x1xf32, #tpu.memory_space<vmem>>, vector<8x1xf32>
    tpu.vector_store %arg5[%c0_20, %c0_21], %46 {strides = array<i32>} : memref<8x1xf32, #tpu.memory_space<vmem>>, vector<8x1xf32>,
    %48 = vector.shape_cast %27 : vector<8x1xf32> to vector<1x8x1xf32>
    %cst_22 = arith.constant dense<0.000000e+00> : vector<1xf32>
    %49 = vector.multi_reduction <add>, %48, %cst_22 [1, 2] : vector<1x8x1xf32> to vector<1xf32>
    %50 = vector.shape_cast %49 : vector<1xf32> to vector<1x1x1xf32>
    %51 = vector.extract %50[0, 0, 0] : f32 from vector<1x1x1xf32>
    %52 = vector.broadcast %51 : f32 to vector<1x1xf32>
    %cst_23 = arith.constant 8.000000e+00 : f32
    %53 = vector.broadcast %cst_23 : f32 to vector<1x1xf32>
    %54 = arith.divf %52, %53 : vector<1x1xf32>
    %cst_24 = arith.constant 0.00999999977 : f32
    %55 = vector.broadcast %cst_24 : f32 to vector<1x1xf32>
    %56 = arith.mulf %54, %55 : vector<1x1xf32>
    %c0_25 = arith.constant 0 : index
    %c0_26 = arith.constant 0 : index
    %57 = memref.load %arg2[%c0_25, %c0_26] : memref<1x1xf32, #tpu.memory_space<smem>>
    %cst_27 = arith.constant 9.900000e-01 : f32
    %58 = arith.mulf %cst_27, %57 : f32
    %59 = vector.broadcast %58 : f32 to vector<1x1xf32>
    %60 = arith.addf %56, %59 : vector<1x1xf32>
    %c0_28 = arith.constant 0 : index
    %c0_29 = arith.constant 0 : index
    %61 = vector.load %arg6[%c0_28, %c0_29] : memref<1x1xf32, #tpu.memory_space<vmem>>, vector<1x1xf32>
    tpu.vector_store %arg6[%c0_28, %c0_29], %60 {strides = array<i32>} : memref<1x1xf32, #tpu.memory_space<vmem>>, vector<1x1xf32>,
    return
  }
}

</mosaic_0001>

<bundles_post_ra>
// kernel: tpu_custom_call.1
= control target key start
LH: loop header
LB: loop body
LE: loop exit
PB: predicated region body
PF: predicated region fallthrough
CT: control target
= control target key end

     0   :  { %13 = vsyncpa [#allocation4], 0  ;;  %s376_s0 = inlined_call_operand.hbm [shape: f32[8,32], index: 0, kind: input, shape index: {}]   ;;  %s377_s1 = inlined_call_operand.hbm [shape: bf16[8,32], index: 1, kind: input, shape index: {}]   ;;  %s378_s2 = inlined_call_operand.<no memory space> [shape: f32[1,1], index: 2, kind: input, shape index: {}]   ;;  %s379_s3 = inlined_call_operand.hbm [shape: bf16[8,32], index: 3, kind: output, shape index: {0}]   ;;  %s380_s4 = inlined_call_operand.vmem [shape: f32[8,1], index: 4, kind: output, shape index: {1}]   ;;  %s381_s5 = inlined_call_operand.vmem [shape: f32[8,1], index: 5, kind: output, shape index: {2}]   ;;  %s382_s6 = inlined_call_operand.hbm [shape: f32[1,1], index: 6, kind: output, shape index: {3}]  }
   0x1   :  { %14 = vsyncpa [#allocation7], 0 }
   0x2   :  { %15 = vsyncpa [#allocation5], 0 }
   0x3   :  { %16 = vsyncpa [#allocation10], 0  ;;  %s22_s23 = sshll.u32 %s376_s0, 4  ;;  %s309_s24 = smov [#allocation3]   ;;  %s23_s23 = int_to_ptr.hbm [resolvable:$true] %s22_s23 }
   0x4   :  { %s24_s25 = sshll.u32 %s309_s24, 4  ;;  %s33_s28 = sshll.u32 %s377_s1, 4  ;;  %s25_s25 = int_to_ptr.vmem [resolvable:$true] %s24_s25  ;;  %s34_s28 = int_to_ptr.hbm [resolvable:$true] %s33_s28 }
   0x5   :  { %27 = dma.hbm_to_vmem [thread:$0]  %s23_s23, 128, %s25_s25, [#allocation4]  }
   0x6   :  { %s310_s29 = smov [#allocation6]  }
   0x7   :  { %s35_s30 = sshll.u32 %s310_s29, 4  ;;  %s36_s30 = int_to_ptr.vmem [resolvable:$true] %s35_s30 }
   0x8   :  { %38 = dma.hbm_to_vmem [thread:$0]  %s34_s28, 64, %s36_s30, [#allocation7]  }
   0x9   :  { %301 = dma.done.wait [#allocation4], 128  }
   0xa   :  { %302 = vsyncadd [#allocation4], 4294967168 }
   0xb   :  { %303 = dma.done.wait [#allocation7], 64  }
   0xc   :  { %304 = vsyncadd [#allocation7], 4294967232  ;;  %v49_v0 = vld [vmem:[#allocation3] sm:$0xff]  ;;  %vm51_vm0 = vcmask 261120   ;;  %v70_v1 = vld [vmem:[#allocation6] sm:$0xf] }
   0xd   :  { %v50_v2 = vmul.f32 %v49_v0, %v49_v0  ;;  %v71_v3 = vunpack.c.l.bf16 %v70_v1  ;;  %vm68_vm4 = vcmask 257024   ;;  %vm113_vm8 = vcmask 7168   ;;  %s153_s11 = sshll.u32 %s379_s3, 4  ;;  %s311_s12 = smov [#allocation8]   ;;  %s154_s11 = int_to_ptr.hbm [resolvable:$true] %s153_s11 }
   0xe   :  { %s151_s13 = sshll.u32 %s311_s12, 4  ;;  %v312_v60 = vmov 8.0   ;;  %s313_s15 = smov [#allocation9]   ;;  %vm144_vm13 = vcmask 0   ;;  %s152_s13 = int_to_ptr.vmem [resolvable:$true] %s151_s13 }
   0xf   :  { %v52_v4 = vsel %vm51_vm0, %v50_v2, 0.0  ;;  %v72_v5 = vmul.f32 %v71_v3, %v71_v3  ;;  %s166_s16 = sshll.u32 %s313_s15, 4  ;;  %s168_s19 = sshll.u32 %s382_s6, 4  ;;  %s167_s16 = int_to_ptr.vmem [resolvable:$true] %s166_s16  ;;  %s169_s19 = int_to_ptr.hbm [resolvable:$true] %s168_s19 }
  0x10   :  { %53 = vadd.xlane.f32.xlu0 %v52_v4 }
  0x11   :  { %v73_v6 = vsel %vm51_vm0, %v72_v5, 0.0 }
  0x18   :  { %74 = vadd.xlane.f32.xlu0 %v73_v6 }
  0x83   :  { %v54_v7 = vpop.xlane.xlu0 %53 }
  0x84   :  { %v55_v8 = vmax.f32 %v54_v7, 1e-24 }
  0x86   :  { %197 = vrsqrt.f32 %v55_v8  ;;  %vm62_vm2 = vweird.f32 %v55_v8 }
  0x8b   :  { %v75_v21 = vpop.xlane.xlu0 %74 }
  0x8c   :  { %v198_v9 = vpop.eup %197  ;;  %v76_v22 = vmax.f32 %v75_v21, 1e-24 }
  0x8d   :  { %v57_v10 = vmul.f32 %v198_v9, %v55_v8  ;;  %vm63_vm1 = vweird.f32 %v198_v9 }
  0x8e   :  { %vm64_vm3 = vmor %vm62_vm2, %vm63_vm1  ;;  %199 = vrsqrt.f32 %v76_v22  ;;  %vm83_vm5 = vweird.f32 %v76_v22 }
  0x8f   :  { %v58_v11 = vmul.f32 %v198_v9, %v57_v10 }
  0x91   :  { %v59_v12 = vmul.f32 0.5, %v58_v11 }
  0x93   :  { %v60_v13 = vsub.f32 1.5, %v59_v12 }
  0x94   :  { %v200_v23 = vpop.eup %199 }
  0x95   :  { %v61_v14 = vmul.f32 %v198_v9, %v60_v13  ;;  %v78_v24 = vmul.f32 %v200_v23, %v76_v22  ;;  %vm84_vm6 = vweird.f32 %v200_v23 }
  0x96   :  { %vm85_vm7 = vmor %vm83_vm5, %vm84_vm6 }
  0x97   :  { %v65_v15 = vsel %vm64_vm3, %v198_v9, %v61_v14  ;;  %v79_v25 = vmul.f32 %v200_v23, %v78_v24 }
  0x98   :  { %v66_v16 = vmul.f32 %v65_v15, %v49_v0 }
  0x99   :  { %v80_v26 = vmul.f32 0.5, %v79_v25 }
  0x9a   :  { %v67_v17 = vpack.c.bf16 %v66_v16, %v66_v16 }
  0x9b   :  { %v81_v27 = vsub.f32 1.5, %v80_v26 }
  0x9c   :  { %v87_v18 = vunpack.c.l.bf16 %v67_v17  ;;  %69 = vst.msk [vmem:[#allocation8] sm:$0xf] %vm68_vm4, %v67_v17 }
  0x9d   :  { %v82_v28 = vmul.f32 %v200_v23, %v81_v27  ;;  %156 = dma.vmem_to_hbm [thread:$0]  %s152_s13, 64, %s154_s11, [#allocation5]  }
  0x9e   :  { %v88_v19 = vmul.f32 %v87_v18, %v71_v3 }
  0x9f   :  { %v86_v30 = vsel %vm85_vm7, %v200_v23, %v82_v28 }
  0xa0   :  { %v89_v20 = vsel %vm51_vm0, %v88_v19, 0.0 }
  0xa1   :  { %90 = vadd.xlane.f32.xlu1 %v89_v20 }
 0x114   :  { %v91_v29 = vpop.xlane.xlu1 %90 }
 0x115   :  { %v92_v31 = vmul.f32 %v91_v29, %v86_v30 }
 0x117   :  { %v188_v32 = vclamps-f32 %v92_v31, 1.0 }
 0x119   :  { %v95_v33 = vmul.f32 %v188_v32, %v188_v32  ;;  %v120_v34 = vsel %vm113_vm8, %v188_v32, 0.0  ;;  %v110_v47 = vmul.f32 0.87758255, %v188_v32  ;;  %v189_v49 = vadd.f32 -0.23971277, %v188_v32 }
 0x11a   :  { %121 = vadd.xlane.f32.xlu1 %v120_v34  ;;  %vm115_vm11 = vcmp.gt.f32.partialorder %v188_v32, -0.87758255 }
 0x11b   :  { %v96_v35 = vsub.f32 1.0, %v95_v33 }
 0x11d   :  { %v97_v36 = vmax.f32 %v96_v35, 0.0 }
 0x11f   :  { %201 = vrsqrt.f32 %v97_v36  ;;  %vm105_vm9 = vcmp.eq.f32.partialorder %v97_v36, inf  ;;  %v108_v44 = vand.u32 2147483648, %v97_v36  ;;  %vm107_vm10 = vcmp.eq.f32.partialorder %v97_v36, 0.0 }
 0x120   :  { %203 = vrcp.f32 %v312_v60 }
 0x125   :  { %v202_v37 = vpop.eup %201 }
 0x126   :  { %v99_v38 = vmul.f32 %v202_v37, %v97_v36  ;;  %v204_v61 = vpop.eup %203 }
 0x127   :  { %v132_v62 = vmul.f32 8.0, %v204_v61  ;;  %vm136_vm12 = vweird.f32 %v204_v61 }
 0x128   :  { %v100_v39 = vmul.f32 %v202_v37, %v99_v38 }
 0x129   :  { %v133_v63 = vsub.f32 1.0, %v132_v62 }
 0x12a   :  { %v101_v40 = vmul.f32 0.5, %v100_v39 }
 0x12b   :  { %v134_v0 = vmul.f32 %v204_v61, %v133_v63 }
 0x12c   :  { %v102_v41 = vsub.f32 1.5, %v101_v40 }
 0x12d   :  { %v135_v1 = vadd.f32 %v204_v61, %v134_v0 }
 0x12e   :  { %v103_v42 = vmul.f32 %v202_v37, %v102_v41 }
 0x12f   :  { %v137_v2 = vsel %vm136_vm12, %v204_v61, %v135_v1 }
 0x130   :  { %v104_v43 = vmul.f32 %v103_v42, %v97_v36 }
 0x132   :  { %v106_v45 = vsel %vm105_vm9, %v97_v36, %v104_v43 }
 0x133   :  { %v109_v46 = vsel %vm107_vm10, %v108_v44, %v106_v45 }
 0x134   :  { %v111_v48 = vmul.f32 0.47942555, %v109_v46 }
 0x136   :  { %v112_v50 = vsub.f32 %v110_v47, %v111_v48 }
 0x138   :  { %114 = vst.msk [vmem:[%s380_s4] sm:$0xff] %vm113_vm8, %v112_v50  ;;  %v117_v51 = vsel %vm115_vm11, %v112_v50, %v189_v49 }
 0x139   :  { %v118_v52 = vmul.f32 30.0, %v117_v51 }
 0x13b   :  { %119 = vst.msk [vmem:[%s381_s5] sm:$0xff] %vm113_vm8, %v118_v52  ;;  %s141_s5 = smul.f32 0.99, %s378_s2 }
 0x13d   :  { %v142_v5 = vstv %s141_s5 }
 0x18d   :  { %v122_v53 = vpop.xlane.xlu1 %121 }
 0x18e   :  { %v123_v54 = vrot.slane %v122_v53, 4 }
 0x190   :  { %v124_v55 = vadd.f32 %v123_v54, %v122_v53 }
 0x192   :  { %v125_v56 = vrot.slane %v124_v55, 2 }
 0x194   :  { %v126_v57 = vadd.f32 %v125_v56, %v124_v55 }
 0x196   :  { %v127_v58 = vrot.slane %v126_v57, 1 }
 0x198   :  { %v128_v59 = vadd.f32 %v127_v58, %v126_v57 }
 0x19a   :  { %190 = vpush %v128_v59 }
 0x1cb   :  { %s191_s14 = spop %190 }
 0x1cc   :  { %v130_v3 = vstv %s191_s14 }
 0x1cd   :  { %v138_v4 = vmul.f32 %v137_v2, %v130_v3 }
 0x1cf   :  { %v139_v6 = vmul.f32 0.01, %v138_v4 }
 0x1d1   :  { %v143_v7 = vadd.f32 %v142_v5, %v139_v6 }
 0x1d3   :  { %145 = vst.msk [vmem:[#allocation9] sm:$0x1] %vm144_vm13, %v143_v7 }
 0x1d4   :  { %171 = dma.vmem_to_hbm [thread:$0]  %s167_s16, 16, %s169_s19, [#allocation10]  }
 0x1d5   :  { %305 = dma.done.wait [#allocation5], 64  }
 0x1d6   :  { %306 = vsyncadd [#allocation5], 4294967232 }
 0x1d7   :  { %307 = dma.done.wait [#allocation10], 16  }
 0x1d8   :  { %308 = vsyncadd [#allocation10], 4294967280 }
 0x1d9   :  { %184 = vsyncpa [#allocation4], 1 }
 0x1da   :  { %185 = vsyncpa [#allocation7], 1 }
 0x1db   :  { %186 = vsyncpa [#allocation5], 1 }
 0x1dc   :  { %187 = vsyncpa [#allocation10], 1 }

</bundles_post_ra>
